<compile_context>
chip_gen: v6e
topology: v6e:2x2x1
jax: 0.10.0
libtpu: 0.0.40
codegen_flags: <defaults>
</compile_context>

<pallas_src>
import jax
import jax.numpy as jnp
from jax.experimental import pallas as pl
from jax.experimental.pallas import tpu as pltpu

AMIN = 1e-10          # torchaudio AmplitudeToDB amin (amplitude domain)
TOP_DB = 80.0         # torchaudio AmplitudeToDB top_db
NEG_INF_DB = 80.0     # HCQT.rescale_decibels negative_infinity_dB
_DB_TO_AMP = 10.0 ** (-TOP_DB / 20.0)   # 1e-4  (top_db clamp in amplitude domain)
_PW_AMIN = AMIN * AMIN                  # 1e-20 (amin in power domain)
_DB_TO_PW = 10.0 ** (-TOP_DB / 10.0)    # 1e-8  (top_db clamp in power domain)


def _features_kernel(amp_floor_ref, w2_ref, lin_ref,
                     am_ref, pw_ref, db_ref, pwh_ref):
    """One (batch, T-tile) block.

    amp_floor_ref : (B,) SMEM  per-batch amplitude floor max(amin, x_max*1e-4)
    w2_ref        : (H,) SMEM  squared harmonic weights
    lin_ref       : (H, F, tT) linear HCQT magnitudes
    am/pw/db_ref  : (H, F, tT) amplitude / power / rescaled-decibel outputs
    pwh_ref       : (F, tT)    harmonic-weighted power sum
    """
    b = pl.program_id(0)
    amp_floor = amp_floor_ref[b]

    x = lin_ref[...]
    # Identity: 10**(max(20*log10(max(x, amin)), db_max - top_db)/20)
    #           == max(x, max(amin, x_max * 10**(-top_db/20)))  -> no exp needed.
    am = jnp.maximum(x, amp_floor)
    pw = am * am
    db = 20.0 * jnp.log10(am)           # already top_db-clamped via amp_floor

    am_ref[...] = am
    pw_ref[...] = pw
    db_ref[...] = 1.0 + db * (1.0 / NEG_INF_DB)   # rescale_decibels

    # features_pw_h = sum_h (am[h] * w_h)^2 == sum_h w_h^2 * pw[h]  (reuse pw).
    num_h = w2_ref.shape[0]             # static; small -> unrolled
    acc = pw[0] * w2_ref[0]
    for h in range(1, num_h):
        acc = acc + pw[h] * w2_ref[h]
    pwh_ref[...] = acc


def _dbh_kernel(pw_floor_ref, pwh_ref, dbh_ref):
    """db_h = rescale(to_decibels(sqrt(pw_h))) on one (batch, T-tile) block.

    sqrt dropped: 20*log10(max(sqrt(p), amin)) == 10*log10(max(p, amin^2)).
    The 3-D torchaudio top_db clamp (GLOBAL max over B,F,T) is folded into the
    scalar-prefetched power floor.
    """
    p = jnp.maximum(pwh_ref[...], pw_floor_ref[0])
    dbh_ref[...] = 1.0 + (10.0 / NEG_INF_DB) * jnp.log10(p)


def _pick_t_tile(T, H, F, budget_bytes=24 << 20, max_tile=512):
    """Largest 128-multiple divisor of T (capped) whose double-buffered working
    set (1 input + 3 outputs of (H,F,tT) + one (F,tT), f32) fits the budget."""
    if T % 128 != 0:
        return T                           # full-extent block is always legal
    bytes_per_lane = 2 * 4 * (4 * H * F + F)   # x2 double buffering, f32
    lanes = max(128, (budget_bytes // bytes_per_lane) // 128 * 128)
    tile = int(min(T, max_tile, lanes))
    tile = max(128, (tile // 128) * 128)
    while T % tile != 0:                   # prefer a divisor -> no partial tiles
        tile -= 128
    return max(tile, 128)


def ss_mpe_get_all_features(features_lin, harmonics, harmonic_weights,
                            t_tile=None):
    """JAX/Pallas equivalent of SS_MPE.get_all_features given linear HCQT features."""
    features_lin = features_lin.astype(jnp.float32)
    B, H, F, T = features_lin.shape

    # --- tiny pre-kernel scalar reductions (hoisted out of the Pallas bodies) ---
    # Per-batch amplitude floor implementing torchaudio's 4-D (per-batch) top_db
    # clamp:  amp_floor = max(amin, max(x_max, amin) * 10**(-top_db/20)).
    x_max = jnp.max(features_lin, axis=(1, 2, 3))                     # (B,)
    amp_floor = jnp.maximum(
        jnp.float32(AMIN),
        jnp.maximum(x_max, jnp.float32(AMIN)) * jnp.float32(_DB_TO_AMP))

    # Squared harmonic weights, kept as a traced SMEM array (jit-safe, no
    # host concretization / recompiles when weights change).
    w2 = jnp.reshape(harmonic_weights, (-1,)).astype(jnp.float32) ** 2
    assert w2.shape[0] == H

    # --- T (lane) tiling -------------------------------------------------------
    if t_tile is None:
        tT = _pick_t_tile(T, H, F)
    else:
        tT = int(t_tile)
    if T % tT != 0:
        tT = T
    nT = T // tT

    spec4 = pl.BlockSpec((pl.Squeezed(), H, F, tT), lambda b, t, *_: (b, 0, 0, t))
    spec3 = pl.BlockSpec((pl.Squeezed(), F, tT), lambda b, t, *_: (b, 0, t))

    # Explicit scoped-VMEM limit (double-buffered working set + headroom),
    # clamped to stay inside v7x's 64 MiB physical VMEM.
    working_set = 2 * 4 * (4 * H * F + F) * tT
    vmem_bytes = int(min(64 << 20, max(32 << 20, working_set + (4 << 20))))

    am, pw, db, pw_h = pl.pallas_call(
        _features_kernel,
        out_shape=(
            jax.ShapeDtypeStruct((B, H, F, T), jnp.float32),   # am
            jax.ShapeDtypeStruct((B, H, F, T), jnp.float32),   # pw
            jax.ShapeDtypeStruct((B, H, F, T), jnp.float32),   # db (rescaled)
            jax.ShapeDtypeStruct((B, F, T), jnp.float32),      # pw_h
        ),
        grid_spec=pltpu.PrefetchScalarGridSpec(
            num_scalar_prefetch=2,
            grid=(B, nT),
            in_specs=[spec4],
            out_specs=(spec4, spec4, spec4, spec3),
        ),
        compiler_params=pltpu.CompilerParams(
            dimension_semantics=("parallel", "parallel"),
            vmem_limit_bytes=vmem_bytes),
    )(amp_floor, w2, features_lin)

    # Global (across-batch) top_db clamp for the 3-D db_h pass, hoisted to a
    # scalar power-domain floor:  max(amin^2, max(p_max, amin^2) * 10**(-top_db/10)).
    p_max = jnp.max(pw_h)
    pw_floor = jnp.maximum(
        jnp.float32(_PW_AMIN),
        jnp.maximum(p_max, jnp.float32(_PW_AMIN)) * jnp.float32(_DB_TO_PW))
    pw_floor = jnp.reshape(pw_floor, (1,))

    db_h = pl.pallas_call(
        _dbh_kernel,
        out_shape=jax.ShapeDtypeStruct((B, F, T), jnp.float32),
        grid_spec=pltpu.PrefetchScalarGridSpec(
            num_scalar_prefetch=1,
            grid=(B, nT),
            in_specs=[pl.BlockSpec((pl.Squeezed(), F, tT), lambda b, t, *_: (b, 0, t))],
            out_specs=pl.BlockSpec((pl.Squeezed(), F, tT), lambda b, t, *_: (b, 0, t)),
        ),
        compiler_params=pltpu.CompilerParams(
            dimension_semantics=("parallel", "parallel"),
            vmem_limit_bytes=32 << 20),
    )(pw_floor, pw_h)

    h_idx = harmonics.index(1)
    return {
        "am": am,
        "pw": pw,
        "db": db,
        "am_1": am[:, h_idx],
        "pw_1": pw[:, h_idx],
        "db_1": db[:, h_idx],
        "pw_h": pw_h,
        "db_h": db_h,
    }


def _reference(features_lin, harmonics, harmonic_weights):
    """Pure-JAX reference mirroring the PyTorch/torchaudio semantics."""
    x = features_lin
    db = 20.0 * jnp.log10(jnp.maximum(x, AMIN))
    db = jnp.maximum(db, jnp.max(db, axis=(1, 2, 3), keepdims=True) - TOP_DB)
    am = 10.0 ** (db / 20.0)
    pw = am ** 2
    db_r = 1.0 + db / NEG_INF_DB
    w = jnp.reshape(harmonic_weights, (1, -1, 1, 1))
    pw_h = jnp.sum((am * w) ** 2, axis=1)
    mag = jnp.sqrt(pw_h)
    db_h = 20.0 * jnp.log10(jnp.maximum(mag, AMIN))
    db_h = jnp.maximum(db_h, jnp.max(db_h) - TOP_DB)
    db_h = 1.0 + db_h / NEG_INF_DB
    h_idx = harmonics.index(1)
    return {
        "am": am, "pw": pw, "db": db_r,
        "am_1": am[:, h_idx], "pw_1": pw[:, h_idx], "db_1": db_r[:, h_idx],
        "pw_h": pw_h, "db_h": db_h,
    }


if __name__ == "__main__":
    key = jax.random.PRNGKey(0)

    # Small, deterministic "hcqt_params"-style setup.
    B, F, T = 2, 16, 256
    harmonics = [0.5, 1, 2, 3]
    H = len(harmonics)

    # Deterministic harmonic weights as in the ss-mpe training scripts:
    # w_h = 1/h^2, zero the sub-harmonics (w > 1), normalize, reshape (-1,1,1).
    hw = 1.0 / jnp.asarray(harmonics, jnp.float32) ** 2
    hw = jnp.where(hw > 1.0, 0.0, hw)
    hw = hw / jnp.sum(hw)
    harmonic_weights = hw.reshape(-1, 1, 1)

    # Linear HCQT magnitudes (nonnegative), B x H x F x T.
    features_lin = jax.random.uniform(key, (B, H, F, T), jnp.float32, 0.0, 1.0)

    # t_tile=128 so the demo actually exercises the (B, T//tT) tiled grid.
    feats = ss_mpe_get_all_features(features_lin, harmonics, harmonic_weights,
                                    t_tile=128)
    feats = jax.block_until_ready(feats)

    ref = _reference(features_lin, harmonics, harmonic_weights)
    for k in ref:
        assert feats[k].shape == ref[k].shape, (k, feats[k].shape, ref[k].shape)
        assert jnp.allclose(feats[k], ref[k], rtol=1e-4, atol=1e-4), k

    print("KERNEL_OK")
</pallas_src>

<mosaic_0001>
module attributes {stable_mosaic.version = 11 : i64} {
  func.func @_features_kernel(%arg0: i32, %arg1: i32, %arg2: memref<2xf32, #tpu.memory_space<smem>>, %arg3: memref<4xf32, #tpu.memory_space<smem>>, %arg4: memref<1x4x16x128xf32, #tpu.memory_space<vmem>>, %arg5: memref<1x4x16x128xf32, #tpu.memory_space<vmem>>, %arg6: memref<1x4x16x128xf32, #tpu.memory_space<vmem>>, %arg7: memref<1x4x16x128xf32, #tpu.memory_space<vmem>>, %arg8: memref<1x16x128xf32, #tpu.memory_space<vmem>>) attributes {dimension_semantics = [#tpu.dimension_semantics<parallel>, #tpu.dimension_semantics<parallel>], iteration_bounds = array<i64: 2, 2>, scalar_prefetch = 2 : i64, scratch_operands = 0 : i64, tpu.core_type = #tpu.core_type<tc>, window_params = [{transform_indices = @transform_0, window_bounds = array<i64: 1, 4, 16, 128>}, {transform_indices = @transform_1, window_bounds = array<i64: 1, 4, 16, 128>}, {transform_indices = @transform_2, window_bounds = array<i64: 1, 4, 16, 128>}, {transform_indices = @transform_3, window_bounds = array<i64: 1, 4, 16, 128>}, {transform_indices = @transform_4, window_bounds = array<i64: 1, 16, 128>}]} {
    %0 = arith.index_cast %arg0 : i32 to index
    %1 = memref.load %arg2[%0] : memref<2xf32, #tpu.memory_space<smem>>
    %c0 = arith.constant 0 : index
    %c0_0 = arith.constant 0 : index
    %c0_1 = arith.constant 0 : index
    %c0_2 = arith.constant 0 : index
    %2 = vector.load %arg4[%c0, %c0_0, %c0_1, %c0_2] : memref<1x4x16x128xf32, #tpu.memory_space<vmem>>, vector<1x4x16x128xf32>
    %3 = vector.shape_cast %2 : vector<1x4x16x128xf32> to vector<4x16x128xf32>
    %4 = vector.broadcast %1 : f32 to vector<4x16x128xf32>
    %5 = arith.maximumf %3, %4 : vector<4x16x128xf32>
    %6 = arith.mulf %5, %5 : vector<4x16x128xf32>
    %7 = math.log %5 : vector<4x16x128xf32>
    %cst = arith.constant 0.434294492 : f32
    %8 = vector.broadcast %cst : f32 to vector<4x16x128xf32>
    %9 = arith.mulf %7, %8 : vector<4x16x128xf32>
    %cst_3 = arith.constant 2.000000e+01 : f32
    %10 = vector.broadcast %cst_3 : f32 to vector<4x16x128xf32>
    %11 = arith.mulf %10, %9 : vector<4x16x128xf32>
    %c0_4 = arith.constant 0 : index
    %c0_5 = arith.constant 0 : index
    %c0_6 = arith.constant 0 : index
    %c0_7 = arith.constant 0 : index
    %12 = vector.load %arg5[%c0_4, %c0_5, %c0_6, %c0_7] : memref<1x4x16x128xf32, #tpu.memory_space<vmem>>, vector<1x4x16x128xf32>
    %13 = vector.shape_cast %12 : vector<1x4x16x128xf32> to vector<4x16x128xf32>
    %14 = vector.shape_cast %5 : vector<4x16x128xf32> to vector<1x4x16x128xf32>
    tpu.vector_store %arg5[%c0_4, %c0_5, %c0_6, %c0_7], %14 {strides = array<i32>} : memref<1x4x16x128xf32, #tpu.memory_space<vmem>>, vector<1x4x16x128xf32>,
    %c0_8 = arith.constant 0 : index
    %c0_9 = arith.constant 0 : index
    %c0_10 = arith.constant 0 : index
    %c0_11 = arith.constant 0 : index
    %15 = vector.load %arg6[%c0_8, %c0_9, %c0_10, %c0_11] : memref<1x4x16x128xf32, #tpu.memory_space<vmem>>, vector<1x4x16x128xf32>
    %16 = vector.shape_cast %15 : vector<1x4x16x128xf32> to vector<4x16x128xf32>
    %17 = vector.shape_cast %6 : vector<4x16x128xf32> to vector<1x4x16x128xf32>
    tpu.vector_store %arg6[%c0_8, %c0_9, %c0_10, %c0_11], %17 {strides = array<i32>} : memref<1x4x16x128xf32, #tpu.memory_space<vmem>>, vector<1x4x16x128xf32>,
    %cst_12 = arith.constant 1.250000e-02 : f32
    %18 = vector.broadcast %cst_12 : f32 to vector<4x16x128xf32>
    %19 = arith.mulf %11, %18 : vector<4x16x128xf32>
    %cst_13 = arith.constant 1.000000e+00 : f32
    %20 = vector.broadcast %cst_13 : f32 to vector<4x16x128xf32>
    %21 = arith.addf %20, %19 : vector<4x16x128xf32>
    %c0_14 = arith.constant 0 : index
    %c0_15 = arith.constant 0 : index
    %c0_16 = arith.constant 0 : index
    %c0_17 = arith.constant 0 : index
    %22 = vector.load %arg7[%c0_14, %c0_15, %c0_16, %c0_17] : memref<1x4x16x128xf32, #tpu.memory_space<vmem>>, vector<1x4x16x128xf32>
    %23 = vector.shape_cast %22 : vector<1x4x16x128xf32> to vector<4x16x128xf32>
    %24 = vector.shape_cast %21 : vector<4x16x128xf32> to vector<1x4x16x128xf32>
    tpu.vector_store %arg7[%c0_14, %c0_15, %c0_16, %c0_17], %24 {strides = array<i32>} : memref<1x4x16x128xf32, #tpu.memory_space<vmem>>, vector<1x4x16x128xf32>,
    %25 = vector.extract_strided_slice %6 {offsets = [0, 0, 0], sizes = [1, 16, 128], strides = [1, 1, 1]} : vector<4x16x128xf32> to vector<1x16x128xf32>
    %26 = vector.shape_cast %25 : vector<1x16x128xf32> to vector<16x128xf32>
    %c0_18 = arith.constant 0 : index
    %27 = memref.load %arg3[%c0_18] : memref<4xf32, #tpu.memory_space<smem>>
    %28 = vector.broadcast %27 : f32 to vector<16x128xf32>
    %29 = arith.mulf %26, %28 : vector<16x128xf32>
    %30 = vector.extract_strided_slice %6 {offsets = [1, 0, 0], sizes = [1, 16, 128], strides = [1, 1, 1]} : vector<4x16x128xf32> to vector<1x16x128xf32>
    %31 = vector.shape_cast %30 : vector<1x16x128xf32> to vector<16x128xf32>
    %c1 = arith.constant 1 : index
    %32 = memref.load %arg3[%c1] : memref<4xf32, #tpu.memory_space<smem>>
    %33 = vector.broadcast %32 : f32 to vector<16x128xf32>
    %34 = arith.mulf %31, %33 : vector<16x128xf32>
    %35 = arith.addf %29, %34 : vector<16x128xf32>
    %36 = vector.extract_strided_slice %6 {offsets = [2, 0, 0], sizes = [1, 16, 128], strides = [1, 1, 1]} : vector<4x16x128xf32> to vector<1x16x128xf32>
    %37 = vector.shape_cast %36 : vector<1x16x128xf32> to vector<16x128xf32>
    %c2 = arith.constant 2 : index
    %38 = memref.load %arg3[%c2] : memref<4xf32, #tpu.memory_space<smem>>
    %39 = vector.broadcast %38 : f32 to vector<16x128xf32>
    %40 = arith.mulf %37, %39 : vector<16x128xf32>
    %41 = arith.addf %35, %40 : vector<16x128xf32>
    %42 = vector.extract_strided_slice %6 {offsets = [3, 0, 0], sizes = [1, 16, 128], strides = [1, 1, 1]} : vector<4x16x128xf32> to vector<1x16x128xf32>
    %43 = vector.shape_cast %42 : vector<1x16x128xf32> to vector<16x128xf32>
    %c3 = arith.constant 3 : index
    %44 = memref.load %arg3[%c3] : memref<4xf32, #tpu.memory_space<smem>>
    %45 = vector.broadcast %44 : f32 to vector<16x128xf32>
    %46 = arith.mulf %43, %45 : vector<16x128xf32>
    %47 = arith.addf %41, %46 : vector<16x128xf32>
    %c0_19 = arith.constant 0 : index
    %c0_20 = arith.constant 0 : index
    %c0_21 = arith.constant 0 : index
    %48 = vector.load %arg8[%c0_19, %c0_20, %c0_21] : memref<1x16x128xf32, #tpu.memory_space<vmem>>, vector<1x16x128xf32>
    %49 = vector.shape_cast %48 : vector<1x16x128xf32> to vector<16x128xf32>
    %50 = vector.shape_cast %47 : vector<16x128xf32> to vector<1x16x128xf32>
    tpu.vector_store %arg8[%c0_19, %c0_20, %c0_21], %50 {strides = array<i32>} : memref<1x16x128xf32, #tpu.memory_space<vmem>>, vector<1x16x128xf32>,
    return
  }
  func.func @transform_0(%arg0: i32, %arg1: i32, %arg2: memref<2xf32, #tpu.memory_space<smem>>, %arg3: memref<4xf32, #tpu.memory_space<smem>>) -> (i32, i32, i32, i32) {
    %c0_i32 = arith.constant 0 : i32
    %c0_i32_0 = arith.constant 0 : i32
    %c0_i32_1 = arith.constant 0 : i32
    return %arg0, %c0_i32, %c0_i32_0, %arg1 : i32, i32, i32, i32
  }
  func.func @transform_1(%arg0: i32, %arg1: i32, %arg2: memref<2xf32, #tpu.memory_space<smem>>, %arg3: memref<4xf32, #tpu.memory_space<smem>>) -> (i32, i32, i32, i32) {
    %c0_i32 = arith.constant 0 : i32
    %c0_i32_0 = arith.constant 0 : i32
    %c0_i32_1 = arith.constant 0 : i32
    return %arg0, %c0_i32, %c0_i32_0, %arg1 : i32, i32, i32, i32
  }
  func.func @transform_2(%arg0: i32, %arg1: i32, %arg2: memref<2xf32, #tpu.memory_space<smem>>, %arg3: memref<4xf32, #tpu.memory_space<smem>>) -> (i32, i32, i32, i32) {
    %c0_i32 = arith.constant 0 : i32
    %c0_i32_0 = arith.constant 0 : i32
    %c0_i32_1 = arith.constant 0 : i32
    return %arg0, %c0_i32, %c0_i32_0, %arg1 : i32, i32, i32, i32
  }
  func.func @transform_3(%arg0: i32, %arg1: i32, %arg2: memref<2xf32, #tpu.memory_space<smem>>, %arg3: memref<4xf32, #tpu.memory_space<smem>>) -> (i32, i32, i32, i32) {
    %c0_i32 = arith.constant 0 : i32
    %c0_i32_0 = arith.constant 0 : i32
    %c0_i32_1 = arith.constant 0 : i32
    return %arg0, %c0_i32, %c0_i32_0, %arg1 : i32, i32, i32, i32
  }
  func.func @transform_4(%arg0: i32, %arg1: i32, %arg2: memref<2xf32, #tpu.memory_space<smem>>, %arg3: memref<4xf32, #tpu.memory_space<smem>>) -> (i32, i32, i32) {
    %c0_i32 = arith.constant 0 : i32
    %c0_i32_0 = arith.constant 0 : i32
    return %arg0, %c0_i32, %arg1 : i32, i32, i32
  }
}

</mosaic_0001>

<bundles_post_ra>
// kernel: tpu_custom_call.1
= control target key start
LH: loop header
LB: loop body
LE: loop exit
PB: predicated region body
PF: predicated region fallthrough
CT: control target
= control target key end

     0   :  { %s1048_s21 = smov [#allocation3]   ;;  %s1484_s0 = inlined_call_operand.hbm [shape: f32[2], index: 0, kind: input, shape index: {}]   ;;  %s1485_s2 = inlined_call_operand.hbm [shape: f32[2,4,16,256], index: 2, kind: input, shape index: {}]   ;;  %s1486_s3 = inlined_call_operand.hbm [shape: f32[2,4,16,256], index: 3, kind: output, shape index: {0}]   ;;  %s1487_s4 = inlined_call_operand.hbm [shape: f32[2,4,16,256], index: 4, kind: output, shape index: {1}]   ;;  %s1488_s5 = inlined_call_operand.hbm [shape: f32[2,4,16,256], index: 5, kind: output, shape index: {2}]   ;;  %s1489_s6 = inlined_call_operand.hbm [shape: f32[2,16,256], index: 6, kind: output, shape index: {3}]   ;;  %s1490_s1 = inlined_call_operand.vmem [shape: f32[4], index: 1, kind: input, shape index: {}]  }
   0x1   :  { %1497 = sst [smem:[#allocation23_spill]] %s1485_s2  ;;  %s14_s26 = sshll.u32 %s1490_s1, 4  ;;  %s15_s26 = int_to_ptr.vmem [resolvable:$true] %s14_s26 }
   0x2   :  { %1498 = sst [smem:[#allocation24_spill]] %s1488_s5  ;;  %s822_s27 = scalar_lea.vmem %s15_s26, 16 }
   0x3   :  { %13 = dma.hbm_to_smem %s1484_s0, 16, %s1048_s21, [#allocation2] }
   0x4   :  { %p823_p0 = scmp.ne.s32.totalorder %s15_s26, %s822_s27  ;;  %p827_p1 = scmp.lt.s32.totalorder %s15_s26, %s15_s26 }
   0x5   :  { %p828_p2 = scmp.lt.s32.totalorder %s822_s27, %s822_s27 }
   0x7   :  { %p829_p3 = por %p828_p2, %p827_p1 }
   0x9   :  { %p830_p4 = pnand %p829_p3, %p823_p0 }
   0xb   :  { %833 = shalt.err (!%p830_p4)  }
   0xc   :  { %s1049_s28 = smov [#allocation4]  }
   0xd   :  { %17 = dma.vmem_to_smem %s15_s26, 16, %s1049_s28, [#allocation2] }
   0xe   :  { %998 = dma.done.wait [#allocation2], 32 }
   0xf   :  { %999 = vsyncadd [#allocation2], 4294967264 }
  0x10   :  { %19 = sfence }
  0x11   :  { %20 = vsyncpa [#allocation6], 0 }
  0x12   :  { %22 = vsyncpa [#allocation6 + $0x1], 0 }
  0x13   :  { %23 = vsyncpa [#allocation7], 0 }
  0x14   :  { %25 = vsyncpa [#allocation7 + $0x1], 0 }
  0x15   :  { %26 = vsyncpa [#allocation10], 0 }
  0x16   :  { %28 = vsyncpa [#allocation10 + $0x1], 0 }
  0x17   :  { %29 = vsyncpa [#allocation13], 0 }
  0x18   :  { %31 = vsyncpa [#allocation13 + $0x1], 0  ;;  %s1102_s0 = smov 0   ;;  %s1104_s1 = smov 0  }
  0x19   :  { %s1106_s29 = smov 0   ;;  %s1108_s30 = smov 0  }
  0x1a   :  { %s1110_s7 = smov 0   ;;  %s1112_s8 = smov 0  }
  0x1b   :  { %s1114_s9 = smov 0   ;;  %s1116_s10 = smov 0  }
  0x1c LB: > { %1499 = sst [smem:[#allocation19_spill]] %s1018_s0  ;;  %s1143_s11 = sadd.s32 4294967295, %s1046_s10   ;;  %s1046_s10 = sphi %s1116_s10, %s37_s10   ;;  %s1042_s9 = sphi %s1114_s9, %s1518_s9   ;;  %s1038_s8 = sphi %s1112_s8, %s1523_s8   ;;  %s1034_s7 = sphi %s1110_s7, %s1516_s7   ;;  %s1030_s30 = sphi %s1108_s30, %s1522_s30   ;;  %s1026_s29 = sphi %s1106_s29, %s1521_s29   ;;  %s1022_s1 = sphi %s1104_s1, %s1520_s1   ;;  %s1018_s0 = sphi %s1102_s0, %s1519_s0  }
  0x1d   : > { %1500 = sst [smem:[#allocation20_spill]] %s1042_s9  ;;  %s1495_s12 = sadd.s32 4294967294, %s1046_s10  }
  0x1e   : > { %s46_s13 = sadd.s32 1, %s1038_s8  ;;  %s49_s14 = sadd.s32 1, %s1042_s9 }
  0x1f   : > { %p47_p5 = scmp.ge.s32.totalorder %s46_s13, 2  ;;  %s58_s15 = sadd.s32 1, %s1026_s29 }
  0x20   : > { %p65_p6 = scmp.ne.s32.totalorder %s1026_s29, %s1022_s1  ;;  %p66_p7 = scmp.eq.s32.totalorder %s1046_s10, 0 }
  0x21   : > { %s1525_s13 = smov (%p47_p5, %s46_s13), 0  ;;  %s1527_s14 = smov (!%p47_p5, %s49_s14), %s1042_s9 }
  0x22   : > { %1501 = sst [smem:[#allocation21_spill]] %s1525_s13  ;;  %s54_s16 = ssub.s32 %s1038_s8, %s1525_s13 }
  0x23   : > { %p1157_p8 = por %p66_p7, %p65_p6  ;;  %p51_p9 = scmp.ge.s32.totalorder %s1527_s14, 2 }
  0x24   : > { %p71_p10 = scmp.ne.s32.totalorder %s1022_s1, %s1018_s0  ;;  %p72_p11 = scmp.eq.s32.totalorder %s1143_s11, 0 }
  0x25   : > { %p97_p12 = scmp.eq.s32.totalorder %s1143_s11, 3  ;;  %s1529_s14 = smov (%p51_p9, %s1527_s14), 0 }
  0x26   : > { %1503 = sst [smem:[#allocation22_spill]] %s1529_s14  ;;  %p1167_p13 = por %p72_p11, %p71_p10 }
  0x27   : > { %p1171_p0 = por %p97_p12, %p65_p6  ;;  %s53_s20 = ssub.s32 %s1042_s9, %s1529_s14 }
  0x28   : > { %p103_p1 = scmp.eq.s32.totalorder %s1495_s12, 3  ;;  %s55_s21 = sor.u32 %s54_s16, %s53_s20 }
  0x29   : > { %p56_p2 = scmp.eq.s32.totalorder %s55_s21, 0  ;;  %p724_p4 = scmp.lt.s32.totalorder %s1046_s10, 4 }
  0x2a   : > { %p1179_p3 = por %p103_p1, %p71_p10  ;;  %s207_s23 = sand.u32 1, %s1026_s29  }
  0x2b   : > { %s1186_s24 = scalar_select %p56_p2, %s1026_s29, %s58_s15  }
  0x2c   : > { %s671_s25 = sshll.u32 %s207_s23, 6  ;;  %s672_s26 = sshll.u32 %s1042_s9, 4 }
  0x2d   : > { %s216_s27 = sadd.s32 %s1038_s8, %s672_s26  ;;  %s211_s28 = scalar_lea.vmem [#allocation5], %s671_s25 }
  0x2e   : > { %s219_s13 = sshll.u32 %s211_s28, 4  ;;  %s673_s0 = sshll.u32 %s216_s27, 7  ;;  %s220_s13 = int_to_ptr.vmem [resolvable:$true] %s219_s13 }
  0x2f   : > { %s1507_s2 = sld [smem:[#allocation23_spill]]  ;;  %p1195_p5 = pnand %p724_p4, %p1157_p8 }
  0x30   : > { %s208_s21 = scalar_lea.sflag [#allocation6], %s207_s23  ;;  %s847_s15 = scalar_lea.vmem %s220_s13, 1024 }
  0x31   : > { %p836_p6 = pneg %p1195_p5  ;;  %p848_p7 = scmp.ne.s32.totalorder %s220_s13, %s847_s15 }
  0x32   : > { %s1050_s25 = smov [#allocation5]  }
  0x33   : > { %p850_p9 = pnand %p848_p7, %p836_p6  ;;  %s852_s26 = sshll.u32 %s1050_s25, 4  ;;  %s853_s26 = int_to_ptr.vmem [resolvable:$false] %s852_s26 }
  0x34   : > { %s854_s27 = scalar_lea.vmem %s853_s26, 2048  ;;  %p855_p11 = scmp.lt.s32.totalorder %s220_s13, %s853_s26 }
  0x35   : > { %s218_s16 = scalar_lea.hbm %s1507_s2, %s673_s0  ;;  %p851_p10 = pneg %p850_p9 }
  0x36   : > { %p856_p12 = scmp.lt.s32.totalorder %s854_s27, %s847_s15 }
  0x38   : > { %p857_p1 = por %p856_p12, %p855_p11 }
  0x3a   : > { %p858_p2 = pnand %p857_p1, %p851_p10 }
  0x3c   : > { %861 = shalt.err (!%p858_p2)
}
  0x3d   : > { %s1051_s5 = smov 256   ;;  %s1052_s0 = smov 128  }
  0x3e   : > { %s1053_s14 = smov 8   ;;  %p674_p8 = scmp.ge.s32.totalorder %s1046_s10, 1 }
  0x3f   : > { %710 = dma.hbm_to_vmem [thread:$0]  (!%p1195_p5), %s218_s16, 1024, %s220_s13, %s208_s21, %s1051_s5, %s1052_s0, %s1053_s14  }
  0x40   : > { %p227_p4 = scmp.lt.s32.totalorder %s1046_s10, 5 }
  0x42   : > { %p228_p6 = pnand %p674_p8, %p227_p4 }
  0x43   : > { %s1206_s17 = sand.u32 (!%p228_p6), 1, %s1022_s1  }
  0x44   : > { %231 = sbr.rel (%p228_p6) target bundleno = 193 (0xc1), region = 24  ;;  %s1209_s23 = sshll.u32 (!%p228_p6), %s1206_s17, 6 }
  0x45   : > { %s234_s28 = scalar_lea.sflag (!%p228_p6), [#allocation6], %s1206_s17  ;;  %s1213_s15 = scalar_lea.vmem (!%p228_p6), [#allocation5], %s1209_s23 }
  0x49   : > { %1001 = dma.done.wait (%p1167_p13), %s234_s28, 1024  }
  0x4a   : > { %1003 = vsyncadd (%p1167_p13), %s234_s28, 4294966272  ;;  %s277_s13 = sld [smem:[#allocation3 + %s1034_s7]]  ;;  %s1225_s21 = scalar_lea.vmem [#allocation9], %s1209_s23  ;;  %v278_v0 = vld [vmem:[%s1213_s15] sm:$0xff]  ;;  %v279_v2 = vld [vmem:[%s1213_s15 + $0x8] sm:$0xff] }
  0x4b   : > { %s1220_s16 = sld [smem:[#allocation4]]  ;;  %s446_s25 = sshll.u32 %s1225_s21, 4  ;;  %v280_v3 = vld [vmem:[%s1213_s15 + $0x10] sm:$0xff]  ;;  %v281_v8 = vld [vmem:[%s1213_s15 + $0x18] sm:$0xff]  ;;  %v282_v9 = vld [vmem:[%s1213_s15 + $0x20] sm:$0xff]  ;;  %s1241_s25 = int_to_ptr.vmem [resolvable:$true] %s446_s25 }
  0x4c   : > { %s1222_s20 = sld [smem:[#allocation4 + $0x1]]  ;;  %s1231_s26 = scalar_lea.vmem [#allocation8], %s1209_s23  ;;  %v283_v10 = vld [vmem:[%s1213_s15 + $0x28] sm:$0xff]  ;;  %v284_v15 = vld [vmem:[%s1213_s15 + $0x30] sm:$0xff]  ;;  %v285_v16 = vld [vmem:[%s1213_s15 + $0x38] sm:$0xff] }
  0x4d   : > { %s1228_s18 = sld [smem:[#allocation4 + $0x2]]  ;;  %s429_s27 = sshll.u32 %s1231_s26, 4  ;;  %s1248_s27 = int_to_ptr.vmem [resolvable:$true] %s429_s27 }
  0x4e   : > { %s679_s5 = sshll.u32 %s1206_s17, 4  ;;  %s1238_s0 = sld [smem:[#allocation4 + $0x3]] }
  0x4f   : > { %s1259_s14 = scalar_lea.vmem [#allocation12], %s679_s5  ;;  %s687_s15 = sshll.u32 %s1034_s7, 4 }
  0x50   : > { %v286_v1 = vstv %s277_s13  ;;  %s862_s5 = scalar_lea.vmem %s1248_s27, 1024 }
  0x51   : > { %v287_v4 = vmax.f32 %v278_v0, %v286_v1  ;;  %v376_v5 = vstv %s1220_s16  ;;  %v288_v6 = vmax.f32 %v279_v2, %v286_v1  ;;  %v1243_v7 = vmax.f32 %v280_v3, %v286_v1  ;;  %s426_s16 = sadd.s32 %s1030_s30, %s687_s15  ;;  %p863_p13 = scmp.ne.s32.totalorder %s1248_s27, %s862_s5 }
  0x52   : > { %v380_v11 = vstv %s1222_s20  ;;  %v1251_v12 = vmax.f32 %v281_v8, %v286_v1  ;;  %v1253_v13 = vmax.f32 %v282_v9, %v286_v1  ;;  %v1255_v14 = vmax.f32 %v283_v10, %v286_v1  ;;  %s1291_s20 = sshll.u32 %s426_s16, 7 }
  0x53   : > { %v295_v17 = vmul.f32 %v287_v4, %v287_v4  ;;  %v296_v18 = vmul.f32 %v288_v6, %v288_v6  ;;  %v297_v19 = vmul.f32 %v1243_v7, %v1243_v7  ;;  %v386_v20 = vstv %s1228_s18  ;;  %335 = vst [vmem:[%s1231_s26] sm:$0xff] %v287_v4  ;;  %336 = vst [vmem:[%s1231_s26 + $0x8] sm:$0xff] %v288_v6  ;;  %s1304_s15 = scalar_lea.hbm %s1487_s4, %s1291_s20  ;;  %s1315_s28 = scalar_lea.hbm %s1486_s3, %s1291_s20 }
  0x54   : > { %337 = vst [vmem:[%s1231_s26 + $0x10] sm:$0xff] %v1243_v7  ;;  %v298_v21 = vmul.f32 %v1251_v12, %v1251_v12  ;;  %v299_v22 = vmul.f32 %v1253_v13, %v1253_v13  ;;  %v300_v23 = vmul.f32 %v1255_v14, %v1255_v14  ;;  %v1277_v24 = vmax.f32 %v284_v15, %v286_v1  ;;  %p864_p5 = pnand %p863_p13, %p1171_p0 }
  0x55   : > { %338 = vst [vmem:[%s1231_s26 + $0x18] sm:$0xff] %v1251_v12  ;;  %339 = vst [vmem:[%s1231_s26 + $0x20] sm:$0xff] %v1253_v13  ;;  %v377_v25 = vmul.f32 %v376_v5, %v295_v17  ;;  %v378_v26 = vmul.f32 %v376_v5, %v296_v18  ;;  %v381_v27 = vmul.f32 %v380_v11, %v297_v19  ;;  %798 = vlog2.f32 %v287_v4 }
  0x56   : > { %340 = vst [vmem:[%s1231_s26 + $0x28] sm:$0xff] %v1255_v14  ;;  %343 = vst [vmem:[%s1225_s21] sm:$0xff] %v295_v17  ;;  %v1289_v28 = vmax.f32 %v285_v16, %v286_v1  ;;  %v382_v29 = vmul.f32 %v380_v11, %v298_v21  ;;  %v387_v30 = vmul.f32 %v386_v20, %v299_v22  ;;  %v392_v35 = vstv %s1238_s0  ;;  %p865_p7 = pneg %p864_p5 }
  0x57   : > { %344 = vst [vmem:[%s1225_s21 + $0x8] sm:$0xff] %v296_v18  ;;  %345 = vst [vmem:[%s1225_s21 + $0x10] sm:$0xff] %v297_v19  ;;  %v388_v31 = vmul.f32 %v386_v20, %v300_v23  ;;  %v301_v32 = vmul.f32 %v1277_v24, %v1277_v24  ;;  %v383_v34 = vadd.f32 %v381_v27, %v377_v25  ;;  %800 = vlog2.f32 %v288_v6 }
  0x58   : > { %346 = vst [vmem:[%s1225_s21 + $0x18] sm:$0xff] %v298_v21  ;;  %347 = vst [vmem:[%s1225_s21 + $0x20] sm:$0xff] %v299_v22  ;;  %v302_v33 = vmul.f32 %v1289_v28, %v1289_v28  ;;  %v384_v37 = vadd.f32 %v382_v29, %v378_v26 }
  0x59   : > { %348 = vst [vmem:[%s1225_s21 + $0x28] sm:$0xff] %v300_v23  ;;  %341 = vst [vmem:[%s1231_s26 + $0x30] sm:$0xff] %v1277_v24  ;;  %v1318_v36 = vmul.f32 %v392_v35, %v301_v32 }
  0x5a   : > { %342 = vst [vmem:[%s1231_s26 + $0x38] sm:$0xff] %v1289_v28  ;;  %349 = vst [vmem:[%s1225_s21 + $0x30] sm:$0xff] %v301_v32  ;;  %s1054_s26 = smov [#allocation8]  }
  0x5b   : > { %s866_s13 = sshll.u32 %s1054_s26, 4  ;;  %s867_s13 = int_to_ptr.vmem [resolvable:$false] %s866_s13 }
  0x5c   : > { %s868_s0 = scalar_lea.vmem %s867_s13, 2048  ;;  %p869_p9 = scmp.lt.s32.totalorder %s1248_s27, %s867_s13 }
  0x5d   : > { %p870_p10 = scmp.lt.s32.totalorder %s868_s0, %s862_s5 }
  0x5f   : > { %p871_p11 = por %p870_p10, %p869_p9 }
  0x61   : > { %p872_p12 = pnand %p871_p11, %p865_p7 }
  0x63   : > { %875 = shalt.err (!%p872_p12)
}
  0x64   : > { %s876_s12 = scalar_lea.hbm %s1315_s28, 1024  ;;  %s880_s26 = scalar_lea.hbm %s1486_s3, 4096 }
  0x65   : > { %p877_p1 = scmp.ne.s32.totalorder %s1315_s28, %s876_s12  ;;  %p881_p4 = scmp.lt.s32.totalorder %s1315_s28, %s1486_s3 }
  0x66   : > { %p882_p6 = scmp.lt.s32.totalorder %s880_s26, %s876_s12 }
  0x67   : > { %p878_p2 = pnand %p877_p1, %p1171_p0 }
  0x68   : > { %p883_p13 = por %p882_p6, %p881_p4 }
  0x69   : > { %p879_p8 = pneg %p878_p2 }
  0x6b   : > { %p884_p5 = pnand %p883_p13, %p879_p8 }
  0x6d   : > { %887 = shalt.err (!%p884_p5)
}
  0x6e   : > { %s1055_s13 = smov 128   ;;  %s1056_s18 = smov 256   ;;  %350 = vst [vmem:[%s1225_s21 + $0x38] sm:$0xff] %v302_v33  ;;  %802 = vlog2.f32 %v1243_v7  ;;  %v389_v38 = vadd.f32 %v387_v30, %v383_v34  ;;  %v394_v39 = vmul.f32 %v392_v35, %v302_v33  ;;  %v390_v40 = vadd.f32 %v388_v31, %v384_v37 }
  0x6f   : > { %s1057_s5 = smov 8   ;;  %s1509_s2 = scalar_lea.sflag [#allocation7], %s1206_s17  ;;  %804 = vlog2.f32 %v1251_v12 }
  0x70   : > { %699 = dma.vmem_to_hbm [thread:$0]  (%p1171_p0), %s1248_s27, 1024, %s1315_s28, %s1509_s2, %s1055_s13, %s1056_s18, %s1057_s5  }
  0x71   : > { %s1510_s0 = sand.u32 1, %s1143_s11   ;;  %s888_s16 = scalar_lea.vmem %s1241_s25, 1024 }
  0x72   : > { %s1352_s12 = scalar_lea.sflag [#allocation10], %s1510_s0  ;;  %p889_p7 = scmp.ne.s32.totalorder %s1241_s25, %s888_s16 }
  0x73   : > { %s1058_s26 = smov [#allocation9]  }
  0x74   : > { %p890_p9 = pnand %p889_p7, %p1171_p0  ;;  %s892_s27 = sshll.u32 %s1058_s26, 4  ;;  %s893_s27 = int_to_ptr.vmem [resolvable:$false] %s892_s27 }
  0x75   : > { %s894_s21 = scalar_lea.vmem %s893_s27, 2048  ;;  %p895_p11 = scmp.lt.s32.totalorder %s1241_s25, %s893_s27 }
  0x76   : > { %p891_p10 = pneg %p890_p9  ;;  %p896_p12 = scmp.lt.s32.totalorder %s894_s21, %s888_s16 }
  0x78   : > { %p897_p1 = por %p896_p12, %p895_p11 }
  0x7a   : > { %p898_p2 = pnand %p897_p1, %p891_p10 }
  0x7c   : > { %901 = shalt.err (!%p898_p2)
}
  0x7d   : > { %s902_s11 = scalar_lea.hbm %s1304_s15, 1024  ;;  %s906_s0 = scalar_lea.hbm %s1487_s4, 4096 }
  0x7e   : > { %p903_p8 = scmp.ne.s32.totalorder %s1304_s15, %s902_s11  ;;  %p907_p13 = scmp.lt.s32.totalorder %s1304_s15, %s1487_s4 }
  0x7f   : > { %p908_p5 = scmp.lt.s32.totalorder %s906_s0, %s902_s11 }
  0x80   : > { %p904_p4 = pnand %p903_p8, %p1171_p0 }
  0x81   : > { %p909_p7 = por %p908_p5, %p907_p13 }
  0x82   : > { %p905_p6 = pneg %p904_p4 }
  0x84   : > { %p910_p9 = pnand %p909_p7, %p905_p6 }
  0x86   : > { %913 = shalt.err (!%p910_p9)
}
  0x87   : > { %700 = dma.vmem_to_hbm [thread:$0]  (%p1171_p0), %s1241_s25, 1024, %s1304_s15, %s1352_s12, %s1055_s13, %s1056_s18, %s1057_s5   ;;  %806 = vlog2.f32 %v1253_v13  ;;  %v395_v41 = vadd.f32 %v1318_v36, %v389_v38  ;;  %v396_v42 = vadd.f32 %v394_v39, %v390_v40 }
  0x88   : > { %s1511_s9 = sshll.u32 %s1259_s14, 4  ;;  %s1512_s16 = sshll.u32 %s1034_s7, 2  ;;  %808 = vlog2.f32 %v1255_v14  ;;  %s1382_s9 = int_to_ptr.vmem [resolvable:$true] %s1511_s9 }
  0x89   : > { %s477_s27 = sadd.s32 %s1030_s30, %s1512_s16  ;;  %810 = vlog2.f32 %v1277_v24  ;;  %397 = vst [vmem:[%s1259_s14] sm:$0xff] %v395_v41  ;;  %398 = vst [vmem:[%s1259_s14 + $0x8] sm:$0xff] %v396_v42  ;;  %s415_s7 = scalar_lea.sflag [#allocation13], %s1206_s17 }
  0x8a   : > { %s694_s21 = sshll.u32 %s477_s27, 7  ;;  %812 = vlog2.f32 %v1289_v28  ;;  %s914_s28 = scalar_lea.vmem %s1382_s9, 256 }
  0x8b   : > { %s1393_s11 = scalar_lea.hbm %s1489_s6, %s694_s21  ;;  %p915_p10 = scmp.ne.s32.totalorder %s1382_s9, %s914_s28 }
  0x8c   : > { %s1059_s30 = smov [#allocation12]  }
  0x8d   : > { %p916_p11 = pnand %p915_p10, %p1171_p0  ;;  %s918_s2 = sshll.u32 %s1059_s30, 4  ;;  %s919_s2 = int_to_ptr.vmem [resolvable:$false] %s918_s2 }
  0x8e   : > { %s920_s0 = scalar_lea.vmem %s919_s2, 512  ;;  %p921_p1 = scmp.lt.s32.totalorder %s1382_s9, %s919_s2 }
  0x8f   : > { %p917_p12 = pneg %p916_p11  ;;  %p922_p2 = scmp.lt.s32.totalorder %s920_s0, %s914_s28 }
  0x91   : > { %p923_p8 = por %p922_p2, %p921_p1 }
  0x93   : > { %p924_p4 = pnand %p923_p8, %p917_p12 }
  0x95   : > { %927 = shalt.err (!%p924_p4)
}
  0x96   : > { %s928_s14 = scalar_lea.hbm %s1393_s11, 256  ;;  %s932_s16 = scalar_lea.hbm %s1489_s6, 1024 }
  0x97   : > { %p929_p6 = scmp.ne.s32.totalorder %s1393_s11, %s928_s14  ;;  %p933_p7 = scmp.lt.s32.totalorder %s1393_s11, %s1489_s6 }
  0x98   : > { %p934_p9 = scmp.lt.s32.totalorder %s932_s16, %s928_s14 }
  0x99   : > { %p930_p13 = pnand %p929_p6, %p1171_p0 }
  0x9a   : > { %p935_p10 = por %p934_p9, %p933_p7 }
  0x9b   : > { %p931_p5 = pneg %p930_p13 }
  0x9d   : > { %p936_p11 = pnand %p935_p10, %p931_p5 }
  0x9f   : > { %939 = shalt.err (!%p936_p11)
}
  0xa0   : > { %702 = dma.vmem_to_hbm [thread:$0]  (%p1171_p0), %s1382_s9, 256, %s1393_s11, %s415_s7, %s1055_s13, %s1056_s18, %s1057_s5   ;;  %v799_v43 = vpop.eup %798 }
  0xa1   : > { %v801_v44 = vpop.eup %800  ;;  %v304_v45 = vmul.f32 0.6931472, %v799_v43  ;;  %s269_s9 = scalar_lea.vmem [#allocation11], %s1209_s23  ;;  %s1513_s11 = sld [smem:[#allocation24_spill]] }
  0xa2   : > { %v803_v46 = vpop.eup %802  ;;  %v306_v47 = vmul.f32 0.6931472, %v801_v44  ;;  %s463_s25 = sshll.u32 %s269_s9, 4  ;;  %s1060_s30 = smov [#allocation11]   ;;  %s1422_s25 = int_to_ptr.vmem [resolvable:$true] %s463_s25 }
  0xa3   : > { %v805_v48 = vpop.eup %804  ;;  %v319_v49 = vmul.f32 0.4342945, %v304_v45  ;;  %v308_v50 = vmul.f32 0.6931472, %v803_v46  ;;  %s940_s28 = scalar_lea.vmem %s1422_s25, 1024  ;;  %s944_s2 = sshll.u32 %s1060_s30, 4  ;;  %s945_s2 = int_to_ptr.vmem [resolvable:$false] %s944_s2 }
  0xa4   : > { %v807_v51 = vpop.eup %806  ;;  %v320_v52 = vmul.f32 0.4342945, %v306_v47  ;;  %v310_v53 = vmul.f32 0.6931472, %v805_v48  ;;  %p941_p12 = scmp.ne.s32.totalorder %s1422_s25, %s940_s28  ;;  %s946_s0 = scalar_lea.vmem %s945_s2, 2048 }
  0xa5   : > { %v809_v54 = vpop.eup %808  ;;  %v327_v55 = vmul.f32 20.0, %v319_v49  ;;  %v321_v56 = vmul.f32 0.4342945, %v308_v50  ;;  %v312_v57 = vmul.f32 0.6931472, %v807_v51  ;;  %p947_p8 = scmp.lt.s32.totalorder %s1422_s25, %s945_s2  ;;  %p948_p4 = scmp.lt.s32.totalorder %s946_s0, %s940_s28 }
  0xa6   : > { %v811_v58 = vpop.eup %810  ;;  %v328_v59 = vmul.f32 20.0, %v320_v52  ;;  %v322_v60 = vmul.f32 0.4342945, %v310_v53  ;;  %v314_v61 = vmul.f32 0.6931472, %v809_v54  ;;  %p942_p1 = pnand %p941_p12, %p1171_p0 }
  0xa7   : > { %v813_v62 = vpop.eup %812  ;;  %v351_v63 = vmul.f32 0.0125, %v327_v55  ;;  %v329_v0 = vmul.f32 20.0, %v321_v56  ;;  %v323_v1 = vmul.f32 0.4342945, %v312_v57  ;;  %s1428_s7 = scalar_lea.hbm %s1513_s11, %s1291_s20  ;;  %p949_p6 = por %p948_p4, %p947_p8 }
  0xa8   : > { %v352_v2 = vmul.f32 0.0125, %v328_v59  ;;  %v330_v3 = vmul.f32 20.0, %v322_v60  ;;  %v324_v4 = vmul.f32 0.4342945, %v314_v61  ;;  %p943_p2 = pneg %p942_p1 }
  0xa9   : > { %v359_v5 = vadd.f32 1.0, %v351_v63  ;;  %v353_v6 = vmul.f32 0.0125, %v329_v0  ;;  %v331_v7 = vmul.f32 20.0, %v323_v1  ;;  %v316_v8 = vmul.f32 0.6931472, %v811_v58 }
  0xaa   : > { %v360_v9 = vadd.f32 1.0, %v352_v2  ;;  %v354_v10 = vmul.f32 0.0125, %v330_v3  ;;  %v332_v11 = vmul.f32 20.0, %v324_v4  ;;  %v318_v12 = vmul.f32 0.6931472, %v813_v62  ;;  %p950_p13 = pnand %p949_p6, %p943_p2 }
  0xab   : > { %367 = vst [vmem:[%s269_s9] sm:$0xff] %v359_v5  ;;  %v361_v13 = vadd.f32 1.0, %v353_v6  ;;  %v355_v14 = vmul.f32 0.0125, %v331_v7  ;;  %v325_v15 = vmul.f32 0.4342945, %v316_v8 }
  0xac   : > { %368 = vst [vmem:[%s269_s9 + $0x8] sm:$0xff] %v360_v9  ;;  %v362_v16 = vadd.f32 1.0, %v354_v10  ;;  %v356_v17 = vmul.f32 0.0125, %v332_v11  ;;  %v326_v18 = vmul.f32 0.4342945, %v318_v12 }
  0xad   : > { %369 = vst [vmem:[%s269_s9 + $0x10] sm:$0xff] %v361_v13  ;;  %v363_v19 = vadd.f32 1.0, %v355_v14  ;;  %v333_v20 = vmul.f32 20.0, %v325_v15 }
  0xae   : > { %370 = vst [vmem:[%s269_s9 + $0x18] sm:$0xff] %v362_v16  ;;  %v364_v21 = vadd.f32 1.0, %v356_v17  ;;  %v334_v22 = vmul.f32 20.0, %v326_v18 }
  0xaf   : > { %371 = vst [vmem:[%s269_s9 + $0x20] sm:$0xff] %v363_v19  ;;  %v357_v23 = vmul.f32 0.0125, %v333_v20 }
  0xb0   : > { %372 = vst [vmem:[%s269_s9 + $0x28] sm:$0xff] %v364_v21  ;;  %v358_v24 = vmul.f32 0.0125, %v334_v22 }
  0xb1   : > { %v365_v25 = vadd.f32 1.0, %v357_v23 }
  0xb2   : > { %v366_v26 = vadd.f32 1.0, %v358_v24 }
  0xb3   : > { %373 = vst [vmem:[%s269_s9 + $0x30] sm:$0xff] %v365_v25 }
  0xb4   : > { %374 = vst [vmem:[%s269_s9 + $0x38] sm:$0xff] %v366_v26 }
  0xb5   : > { %953 = shalt.err (!%p950_p13)
}
  0xb6   : > { %s954_s20 = scalar_lea.hbm %s1428_s7, 1024  ;;  %s958_s26 = scalar_lea.hbm %s1513_s11, 4096 }
  0xb7   : > { %p955_p5 = scmp.ne.s32.totalorder %s1428_s7, %s954_s20  ;;  %p959_p10 = scmp.lt.s32.totalorder %s1428_s7, %s1513_s11 }
  0xb8   : > { %p960_p11 = scmp.lt.s32.totalorder %s958_s26, %s954_s20 }
  0xb9   : > { %p956_p7 = pnand %p955_p5, %p1171_p0 }
  0xba   : > { %p961_p12 = por %p960_p11, %p959_p10 }
  0xbb   : > { %p957_p9 = pneg %p956_p7 }
  0xbd   : > { %p962_p1 = pnand %p961_p12, %p957_p9 }
  0xbf   : > { %965 = shalt.err (!%p962_p1)
}
  0xc0   : > { %701 = dma.vmem_to_hbm [thread:$0]  (%p1171_p0), %s1422_s25, 1024, %s1428_s7, %s1352_s12, %s1055_s13, %s1056_s18, %s1057_s5  }
  0xc1 PF: > { %s1514_s21 = sld [smem:[#allocation19_spill]]  ;;  %p725_p2 = scmp.ge.s32.totalorder %s1046_s10, 2 }
  0xc3   : > { %p712_p8 = pnand %p725_p2, %p1179_p3 }
  0xc5   : > { %p713_p4 = pneg %p712_p8 }
  0xc7   : > { %s495_s9 = sand.u32 1, %s1514_s21  }
  0xc8   : > { %s496_s23 = scalar_lea.sflag [#allocation7], %s495_s9 }
  0xc9   : > { %1005 = dma.done.wait (%p713_p4), %s496_s23, 1024  }
  0xca   : > { %1007 = vsyncadd (%p713_p4), %s496_s23, 4294966272  ;;  %s1515_s19 = sadd.s32 4294967294, %s1046_s10  }
  0xcb   : > { %s504_s15 = sand.u32 1, %s1515_s19  }
  0xcc   : > { %s505_s28 = scalar_lea.sflag [#allocation10], %s504_s15 }
  0xcd   : > { %1009 = dma.done.wait (%p713_p4), %s505_s28, 2048  }
  0xce   : > { %1011 = vsyncadd (%p713_p4), %s505_s28, 4294965248  ;;  %s523_s30 = scalar_lea.sflag [#allocation13], %s495_s9 }
  0xcf   : > { %1013 = dma.done.wait (%p713_p4), %s523_s30, 256  }
  0xd0   : > { %1015 = vsyncadd (%p713_p4), %s523_s30, 4294967040  ;;  %s37_s10 = sadd.s32 1, %s1046_s10   ;;  %s1516_s7 = sld [smem:[#allocation20_spill]] }
  0xd1   : > { %p34_p0 = scmp.ge.s32.totalorder %s37_s10, 6   ;;  %s1517_s22 = sld [smem:[#allocation21_spill]] }
  0xd2   : > { %s1518_s9 = sld [smem:[#allocation22_spill]]  ;;  %s1519_s0 = smov %s1022_s1 }
  0xd3   : > { %s1520_s1 = smov %s1026_s29  ;;  %s1521_s29 = smov %s1186_s24 }
  0xd4   : > { %s1522_s30 = smov %s1038_s8  ;;  %36 = sbr.rel (!%p34_p0) target bundleno = 28 (0x1c), region = 118 }
  0xd7   : > { %s1523_s8 = smov %s1517_s22 }
  0xd9   :  { %528 = vsyncpa [#allocation6], 1 }
  0xda   :  { %530 = vsyncpa [#allocation6 + $0x1], 1 }
  0xdb   :  { %531 = vsyncpa [#allocation7], 1 }
  0xdc   :  { %533 = vsyncpa [#allocation7 + $0x1], 1 }
  0xdd   :  { %534 = vsyncpa [#allocation10], 1 }
  0xde   :  { %536 = vsyncpa [#allocation10 + $0x1], 1 }
  0xdf   :  { %537 = vsyncpa [#allocation13], 1 }
  0xe0   :  { %539 = vsyncpa [#allocation13 + $0x1], 1 }

</bundles_post_ra>
